<compile_context>
chip_gen: v6e
topology: v6e:2x2x1
jax: 0.10.0
libtpu: 0.0.40
codegen_flags: <defaults>
</compile_context>

<pallas_src>
import jax
import jax.numpy as jnp
from jax.experimental import pallas as pl
from jax.experimental.pallas import tpu as pltpu

BN_EPS = 1e-4
COMPUTE_DTYPE = jnp.bfloat16   # matmul input dtype; accumulation is always f32

# Preferred tile sizes (clamped / aligned to the actual problem size).
TM_PREF = 256    # rows, M = N*H*W
TN_PREF = 256    # output channels (256-wide MXU on v6e/v7x)
TK_PREF = 512    # reduction, K = 9*Cin

VMEM_LIMIT = 48 * 1024 * 1024   # fits under v7x's 64 MiB per-TensorCore VMEM


def _round_up(x, m):
    return (x + m - 1) // m * m


def _choose_tile(size, pref, align):
    """Return (tile, padded_size) with tile dividing padded_size, tile % align == 0."""
    if size <= pref:
        p = _round_up(size, align)
        return p, p
    return pref, _round_up(size, pref)


def _pad2d(x, rows, cols):
    r, c = x.shape
    if r == rows and c == cols:        # skip the copy when already aligned
        return x
    return jnp.pad(x, ((0, rows - r), (0, cols - c)))


# ---------------------------------------------------------------------------
# Pallas kernel 1: tiled matmul (bf16 in, f32 acc) + per-channel partial stats
# ---------------------------------------------------------------------------
def _mm_stats_kernel(a_ref, b_ref, y_ref, stats_ref, acc_ref):
    k = pl.program_id(2)

    @pl.when(k == 0)
    def _():
        acc_ref[...] = jnp.zeros_like(acc_ref)

    acc_ref[...] += jnp.dot(a_ref[...], b_ref[...],
                            preferred_element_type=jnp.float32)

    @pl.when(k == pl.num_programs(2) - 1)
    def _():
        y = acc_ref[...]
        y_ref[...] = y
        # Per-channel partial sums for this M-tile (rows 0 and 1 of an 8-row block;
        # padded rows of y are exactly zero so they contribute nothing).
        s1 = jnp.sum(y, axis=0, keepdims=True)
        s2 = jnp.sum(y * y, axis=0, keepdims=True)
        pad = jnp.zeros((6, y.shape[1]), jnp.float32)
        stats_ref[...] = jnp.concatenate([s1, s2, pad], axis=0)


# ---------------------------------------------------------------------------
# Pallas kernel 2: lane-dense normalize (scale/bias) + ReLU + cast
# ---------------------------------------------------------------------------
def _scale_bias_relu_kernel(y_ref, s_ref, b_ref, o_ref):
    o = jnp.maximum(y_ref[...] * s_ref[...] + b_ref[...], 0.0)
    o_ref[...] = o.astype(o_ref.dtype)


def conv_matmul_bn_relu(patches, w2d, gamma, beta):
    """ReLU(BatchNorm_train(patches @ w2d)).  patches:(M,K), w2d:(K,Cout) in COMPUTE_DTYPE.
    Returns (M, Cout) in COMPUTE_DTYPE."""
    M, K = patches.shape
    Cout = w2d.shape[1]
    TM, Mp = _choose_tile(M, TM_PREF, 8)
    TK, Kp = _choose_tile(K, TK_PREF, 128)
    TN, Cp = _choose_tile(Cout, TN_PREF, 128)
    mt, nt, kt = Mp // TM, Cp // TN, Kp // TK

    ap = _pad2d(patches, Mp, Kp)
    bp = _pad2d(w2d, Kp, Cp)

    y, pstats = pl.pallas_call(
        _mm_stats_kernel,
        out_shape=(
            jax.ShapeDtypeStruct((Mp, Cp), jnp.float32),
            jax.ShapeDtypeStruct((mt * 8, Cp), jnp.float32),
        ),
        grid_spec=pltpu.PrefetchScalarGridSpec(
            num_scalar_prefetch=0,
            grid=(mt, nt, kt),
            in_specs=[
                pl.BlockSpec((TM, TK), lambda i, j, k: (i, k)),
                pl.BlockSpec((TK, TN), lambda i, j, k: (k, j)),
            ],
            out_specs=(
                pl.BlockSpec((TM, TN), lambda i, j, k: (i, j)),
                pl.BlockSpec((8, TN), lambda i, j, k: (i, j)),
            ),
            scratch_shapes=[pltpu.VMEM((TM, TN), jnp.float32)],
        ),
        compiler_params=pltpu.CompilerParams(
            dimension_semantics=("parallel", "parallel", "arbitrary"),
            vmem_limit_bytes=VMEM_LIMIT,
        ),
    )(ap, bp)

    # Training-mode BN statistics (biased variance) from the tiny partial-stats array.
    pst = pstats.reshape(mt, 8, Cp)
    s1 = jnp.sum(pst[:, 0, :Cout], axis=0)
    s2 = jnp.sum(pst[:, 1, :Cout], axis=0)
    inv_m = 1.0 / float(M)
    mean = s1 * inv_m
    var = jnp.maximum(s2 * inv_m - mean * mean, 0.0)
    inv_std = jax.lax.rsqrt(var + BN_EPS)
    scale = gamma * inv_std
    bias = beta - mean * scale

    if Cp == Cout:
        scale_row = scale.reshape(1, Cp).astype(jnp.float32)
        bias_row = bias.reshape(1, Cp).astype(jnp.float32)
    else:
        scale_row = jnp.zeros((1, Cp), jnp.float32).at[0, :Cout].set(scale)
        bias_row = jnp.zeros((1, Cp), jnp.float32).at[0, :Cout].set(bias)

    out = pl.pallas_call(
        _scale_bias_relu_kernel,
        out_shape=jax.ShapeDtypeStruct((Mp, Cp), COMPUTE_DTYPE),
        grid_spec=pltpu.PrefetchScalarGridSpec(
            num_scalar_prefetch=0,
            grid=(mt, nt),
            in_specs=[
                pl.BlockSpec((TM, TN), lambda i, j: (i, j)),
                pl.BlockSpec((1, TN), lambda i, j: (0, j)),
                pl.BlockSpec((1, TN), lambda i, j: (0, j)),
            ],
            out_specs=pl.BlockSpec((TM, TN), lambda i, j: (i, j)),
        ),
        compiler_params=pltpu.CompilerParams(
            dimension_semantics=("parallel", "parallel"),
            vmem_limit_bytes=VMEM_LIMIT,
        ),
    )(y, scale_row, bias_row)

    return out[:M, :Cout]


# ---------------------------------------------------------------------------
# Plain-JAX glue
# ---------------------------------------------------------------------------
def _im2col_3x3(x):
    # x: (N, H, W, C) -> (N*H*W, 9*C), patch order (dh, dw, c)  [pad=1, stride=1]
    # TODO(synk): form patches inside the matmul kernel from a spatially tiled input
    # with a 1-pixel halo (9 shifted VMEM reads) to avoid the 9x HBM inflation.
    N, H, W, C = x.shape
    xp = jnp.pad(x, ((0, 0), (1, 1), (1, 1), (0, 0)))
    cols = [xp[:, dh:dh + H, dw:dw + W, :] for dh in range(3) for dw in range(3)]
    return jnp.concatenate(cols, axis=-1).reshape(N * H * W, 9 * C)


def conv_bn_relu(x, weight, gamma, beta):
    """x: (N,H,W,Cin) COMPUTE_DTYPE, weight: (3,3,Cin,Cout) -> (N,H,W,Cout)."""
    N, H, W, Cin = x.shape
    Cout = weight.shape[-1]
    patches = _im2col_3x3(x)
    w2d = weight.reshape(9 * Cin, Cout).astype(COMPUTE_DTYPE)
    y = conv_matmul_bn_relu(patches, w2d, gamma, beta)
    return y.reshape(N, H, W, Cout)


def upsample_bilinear(x, H, W):
    # F.upsample(mode='bilinear') -> F.interpolate(align_corners=False); jax.image.resize
    # 'bilinear' uses the same half-pixel convention for upsampling.
    N, _, _, C = x.shape
    return jax.image.resize(x, (N, H, W, C), method='bilinear')


# ---------------------------------------------------------------------------
# StackDecoder
# ---------------------------------------------------------------------------
def make_params(x_big_channels, x_channels, y_channels, key):
    keys = jax.random.split(key, 3)

    def conv_bn(k, cin, cout):
        w = (jax.random.normal(k, (3, 3, cin, cout), jnp.float32) * 0.05).astype(COMPUTE_DTYPE)
        return (w, jnp.ones((cout,), jnp.float32), jnp.zeros((cout,), jnp.float32))

    cin0 = x_big_channels + x_channels
    return {'decode': [conv_bn(keys[0], cin0, y_channels),
                       conv_bn(keys[1], y_channels, y_channels),
                       conv_bn(keys[2], y_channels, y_channels)]}


def stack_decoder_forward(x_big_nchw, x_nchw, params):
    # NCHW (PyTorch) -> NHWC (internal)
    x_big = jnp.transpose(x_big_nchw, (0, 2, 3, 1))
    x = jnp.transpose(x_nchw, (0, 2, 3, 1))
    N, H, W, _ = x_big.shape

    y = upsample_bilinear(x.astype(jnp.float32), H, W)
    # torch.cat([y, x_big], dim=1)
    # TODO(synk): fuse the skip concat into the first conv's K axis (two accumulating
    # matmul passes over y and x_big) instead of materializing the concatenated tensor.
    y = jnp.concatenate([y.astype(COMPUTE_DTYPE), x_big.astype(COMPUTE_DTYPE)], axis=-1)

    for w, g, b in params['decode']:
        y = conv_bn_relu(y, w, g, b)

    return jnp.transpose(y.astype(jnp.float32), (0, 3, 1, 2))  # NHWC -> NCHW


if __name__ == "__main__":
    key = jax.random.PRNGKey(0)
    k_p, k_big, k_x = jax.random.split(key, 3)

    N = 2
    X_BIG_CH, X_CH, Y_CH = 8, 8, 16
    H, W = 16, 16          # x_big spatial size
    h, w = 8, 8            # x spatial size (decoder upsamples 2x)

    params = make_params(X_BIG_CH, X_CH, Y_CH, k_p)
    x_big = jax.random.normal(k_big, (N, X_BIG_CH, H, W), jnp.float32)
    x = jax.random.normal(k_x, (N, X_CH, h, w), jnp.float32)

    fwd = jax.jit(stack_decoder_forward)
    out = jax.block_until_ready(fwd(x_big, x, params))
    assert out.shape == (N, Y_CH, H, W), out.shape
    assert bool(jnp.all(jnp.isfinite(out)))
    print("KERNEL_OK")
</pallas_src>

<mosaic_0001>
module attributes {stable_mosaic.version = 11 : i64} {
  func.func @_mm_stats_kernel(%arg0: i32, %arg1: i32, %arg2: i32, %arg3: memref<256x256xbf16, #tpu.memory_space<vmem>>, %arg4: memref<256x128xbf16, #tpu.memory_space<vmem>>, %arg5: memref<256x128xf32, #tpu.memory_space<vmem>>, %arg6: memref<8x128xf32, #tpu.memory_space<vmem>>, %arg7: memref<256x128xf32, #tpu.memory_space<vmem>>) attributes {dimension_semantics = [#tpu.dimension_semantics<parallel>, #tpu.dimension_semantics<parallel>, #tpu.dimension_semantics<arbitrary>], iteration_bounds = array<i64: 2, 1, 1>, scalar_prefetch = 0 : i64, scratch_operands = 1 : i64, tpu.core_type = #tpu.core_type<tc>, window_params = [{transform_indices = @transform_0, window_bounds = array<i64: 256, 256>}, {transform_indices = @transform_1, window_bounds = array<i64: 256, 128>}, {transform_indices = @transform_2, window_bounds = array<i64: 256, 128>}, {transform_indices = @transform_3, window_bounds = array<i64: 8, 128>}]} {
    %c0_i32 = arith.constant 0 : i32
    %0 = arith.cmpi eq, %arg2, %c0_i32 : i32
    %1 = arith.extui %0 : i1 to i32
    %c0_i32_0 = arith.constant 0 : i32
    %2 = arith.cmpi ne, %1, %c0_i32_0 : i32
    scf.if %2 {
      %cst_10 = arith.constant 0.000000e+00 : f32
      %12 = vector.broadcast %cst_10 : f32 to vector<256x128xf32>
      %c0_11 = arith.constant 0 : index
      %c0_12 = arith.constant 0 : index
      %13 = vector.load %arg7[%c0_11, %c0_12] : memref<256x128xf32, #tpu.memory_space<vmem>>, vector<256x128xf32>
      tpu.vector_store %arg7[%c0_11, %c0_12], %12 {strides = array<i32>} : memref<256x128xf32, #tpu.memory_space<vmem>>, vector<256x128xf32>,
    } else {
    }
    %c0 = arith.constant 0 : index
    %c0_1 = arith.constant 0 : index
    %3 = vector.load %arg7[%c0, %c0_1] : memref<256x128xf32, #tpu.memory_space<vmem>>, vector<256x128xf32>
    %c0_2 = arith.constant 0 : index
    %c0_3 = arith.constant 0 : index
    %4 = vector.load %arg3[%c0_2, %c0_3] : memref<256x256xbf16, #tpu.memory_space<vmem>>, vector<256x256xbf16>
    %c0_4 = arith.constant 0 : index
    %c0_5 = arith.constant 0 : index
    %5 = vector.load %arg4[%c0_4, %c0_5] : memref<256x128xbf16, #tpu.memory_space<vmem>>, vector<256x128xbf16>
    %cst = arith.constant dense<0.000000e+00> : vector<256x128xf32>
    %6 = tpu.matmul %4, %5, %cst {dimension_numbers = #tpu.dot_dimension_numbers<[1], [0], [0], [1], [0, 0, 1, 1], [], []>} : vector<256x256xbf16>, vector<256x128xbf16>, vector<256x128xf32> -> vector<256x128xf32>
    %7 = arith.addf %3, %6 : vector<256x128xf32>
    %c0_6 = arith.constant 0 : index
    %c0_7 = arith.constant 0 : index
    %8 = vector.load %arg7[%c0_6, %c0_7] : memref<256x128xf32, #tpu.memory_space<vmem>>, vector<256x128xf32>
    tpu.vector_store %arg7[%c0_6, %c0_7], %7 {strides = array<i32>} : memref<256x128xf32, #tpu.memory_space<vmem>>, vector<256x128xf32>,
    %c0_i32_8 = arith.constant 0 : i32
    %9 = arith.cmpi eq, %arg2, %c0_i32_8 : i32
    %10 = arith.extui %9 : i1 to i32
    %c0_i32_9 = arith.constant 0 : i32
    %11 = arith.cmpi ne, %10, %c0_i32_9 : i32
    scf.if %11 {
      %c0_10 = arith.constant 0 : index
      %c0_11 = arith.constant 0 : index
      %12 = vector.load %arg7[%c0_10, %c0_11] : memref<256x128xf32, #tpu.memory_space<vmem>>, vector<256x128xf32>
      %c0_12 = arith.constant 0 : index
      %c0_13 = arith.constant 0 : index
      %13 = vector.load %arg5[%c0_12, %c0_13] : memref<256x128xf32, #tpu.memory_space<vmem>>, vector<256x128xf32>
      tpu.vector_store %arg5[%c0_12, %c0_13], %12 {strides = array<i32>} : memref<256x128xf32, #tpu.memory_space<vmem>>, vector<256x128xf32>,
      %cst_14 = arith.constant dense<0.000000e+00> : vector<128xf32>
      %14 = vector.multi_reduction <add>, %12, %cst_14 [0] : vector<256x128xf32> to vector<128xf32>
      %15 = vector.shape_cast %14 : vector<128xf32> to vector<1x128xf32>
      %16 = arith.mulf %12, %12 : vector<256x128xf32>
      %cst_15 = arith.constant dense<0.000000e+00> : vector<128xf32>
      %17 = vector.multi_reduction <add>, %16, %cst_15 [0] : vector<256x128xf32> to vector<128xf32>
      %18 = vector.shape_cast %17 : vector<128xf32> to vector<1x128xf32>
      %cst_16 = arith.constant 0.000000e+00 : f32
      %19 = vector.broadcast %cst_16 : f32 to vector<6x128xf32>
      %20 = tpu.concatenate %15, %18, %19 in 0 : vector<1x128xf32>, vector<1x128xf32>, vector<6x128xf32> -> vector<8x128xf32>
      %c0_17 = arith.constant 0 : index
      %c0_18 = arith.constant 0 : index
      %21 = vector.load %arg6[%c0_17, %c0_18] : memref<8x128xf32, #tpu.memory_space<vmem>>, vector<8x128xf32>
      tpu.vector_store %arg6[%c0_17, %c0_18], %20 {strides = array<i32>} : memref<8x128xf32, #tpu.memory_space<vmem>>, vector<8x128xf32>,
    } else {
    }
    return
  }
  func.func @transform_0(%arg0: i32, %arg1: i32, %arg2: i32) -> (i32, i32) {
    %c0_i32 = arith.constant 0 : i32
    return %arg0, %arg2 : i32, i32
  }
  func.func @transform_1(%arg0: i32, %arg1: i32, %arg2: i32) -> (i32, i32) {
    %c0_i32 = arith.constant 0 : i32
    return %arg2, %arg1 : i32, i32
  }
  func.func @transform_2(%arg0: i32, %arg1: i32, %arg2: i32) -> (i32, i32) {
    %c0_i32 = arith.constant 0 : i32
    return %arg0, %arg1 : i32, i32
  }
  func.func @transform_3(%arg0: i32, %arg1: i32, %arg2: i32) -> (i32, i32) {
    %c0_i32 = arith.constant 0 : i32
    return %arg0, %arg1 : i32, i32
  }
}

module attributes {stable_mosaic.version = 11 : i64} {
  func.func @_scale_bias_relu_kernel(%arg0: i32, %arg1: i32, %arg2: memref<256x128xf32, #tpu.memory_space<vmem>>, %arg3: memref<1x128xf32, #tpu.memory_space<vmem>>, %arg4: memref<1x128xf32, #tpu.memory_space<vmem>>, %arg5: memref<256x128xbf16, #tpu.memory_space<vmem>>) attributes {dimension_semantics = [#tpu.dimension_semantics<parallel>, #tpu.dimension_semantics<parallel>], iteration_bounds = array<i64: 2, 1>, scalar_prefetch = 0 : i64, scratch_operands = 0 : i64, tpu.core_type = #tpu.core_type<tc>, window_params = [{transform_indices = @transform_0, window_bounds = array<i64: 256, 128>}, {transform_indices = @transform_1, window_bounds = array<i64: 1, 128>}, {transform_indices = @transform_2, window_bounds = array<i64: 1, 128>}, {transform_indices = @transform_3, window_bounds = array<i64: 256, 128>}]} {
    %c0 = arith.constant 0 : index
    %c0_0 = arith.constant 0 : index
    %0 = vector.load %arg2[%c0, %c0_0] : memref<256x128xf32, #tpu.memory_space<vmem>>, vector<256x128xf32>
    %c0_1 = arith.constant 0 : index
    %c0_2 = arith.constant 0 : index
    %1 = vector.load %arg3[%c0_1, %c0_2] : memref<1x128xf32, #tpu.memory_space<vmem>>, vector<1x128xf32>
    %2 = vector.broadcast %1 : vector<1x128xf32> to vector<256x128xf32>
    %3 = arith.mulf %0, %2 : vector<256x128xf32>
    %c0_3 = arith.constant 0 : index
    %c0_4 = arith.constant 0 : index
    %4 = vector.load %arg4[%c0_3, %c0_4] : memref<1x128xf32, #tpu.memory_space<vmem>>, vector<1x128xf32>
    %5 = vector.broadcast %4 : vector<1x128xf32> to vector<256x128xf32>
    %6 = arith.addf %3, %5 : vector<256x128xf32>
    %cst = arith.constant 0.000000e+00 : f32
    %7 = vector.broadcast %cst : f32 to vector<256x128xf32>
    %8 = arith.maximumf %6, %7 : vector<256x128xf32>
    %9 = arith.truncf %8 : vector<256x128xf32> to vector<256x128xbf16>
    %c0_5 = arith.constant 0 : index
    %c0_6 = arith.constant 0 : index
    %10 = vector.load %arg5[%c0_5, %c0_6] : memref<256x128xbf16, #tpu.memory_space<vmem>>, vector<256x128xbf16>
    tpu.vector_store %arg5[%c0_5, %c0_6], %9 {strides = array<i32>} : memref<256x128xbf16, #tpu.memory_space<vmem>>, vector<256x128xbf16>,
    return
  }
  func.func @transform_0(%arg0: i32, %arg1: i32) -> (i32, i32) {
    %c0_i32 = arith.constant 0 : i32
    return %arg0, %arg1 : i32, i32
  }
  func.func @transform_1(%arg0: i32, %arg1: i32) -> (i32, i32) {
    %c0_i32 = arith.constant 0 : i32
    %c0_i32_0 = arith.constant 0 : i32
    return %c0_i32, %arg1 : i32, i32
  }
  func.func @transform_2(%arg0: i32, %arg1: i32) -> (i32, i32) {
    %c0_i32 = arith.constant 0 : i32
    %c0_i32_0 = arith.constant 0 : i32
    return %c0_i32, %arg1 : i32, i32
  }
  func.func @transform_3(%arg0: i32, %arg1: i32) -> (i32, i32) {
    %c0_i32 = arith.constant 0 : i32
    return %arg0, %arg1 : i32, i32
  }
}

</mosaic_0001>

<bundles_post_ra>
// kernel: stack_decoder_forward.7
= control target key start
LH: loop header
LB: loop body
LE: loop exit
PB: predicated region body
PF: predicated region fallthrough
CT: control target
= control target key end

     0   :  { %s879_s12 = smov 0   ;;  %s881_s13 = smov 0   ;;  %s1042_s0 = inlined_call_operand.vmem [shape: f32[512,128], index: 0, kind: input, shape index: {}]   ;;  %s1043_s1 = inlined_call_operand.vmem [shape: f32[1,128], index: 1, kind: input, shape index: {}]   ;;  %s1044_s2 = inlined_call_operand.vmem [shape: f32[1,128], index: 2, kind: input, shape index: {}]   ;;  %s1045_s3 = inlined_call_operand.vmem [shape: bf16[512,128], index: 3, kind: output, shape index: {}]  }
   0x1   :  { %s883_s14 = smov 0  }
   0x2 LB: > { %s25_s15 = sadd.s32 1, %s853_s13  ;;  %p643_p0 = scmp.ge.s32.totalorder %s857_s14, 1  ;;  %s857_s14 = sphi %s883_s14, %s13_s14   ;;  %s853_s13 = sphi %s881_s13, %s1047_s13   ;;  %s849_s12 = sphi %s879_s12, %s1046_s12  }
   0x3   : > { %p27_p1 = scmp.ge.s32.totalorder %s25_s15, 2  ;;  %p173_p2 = scmp.lt.s32.totalorder %s857_s14, 3 }
   0x5   : > { %s1049_s15 = smov (%p27_p1, %s25_s15), 0  ;;  %p174_p3 = pnand %p643_p0, %p173_p2 }
   0x6   : > { %s644_s16 = sshll.u32 (!%p174_p3), %s849_s12, 5 }
   0x7   : > { %177 = sbr.rel (%p174_p3) target bundleno = 50 (0x32), region = 32  ;;  %p210_p4 = scmp.lt.s32.totalorder (!%p174_p3), %s644_s16, 63 }
   0xc   : > { %s1051_s16 = smov (!%p210_p4, %s644_s16), 63  ;;  %v903_v0 = vld [vmem:[%s1043_s1] ss:$0 sm:$0xff] }
   0xd   : > { %s645_s17 = sshll.u32 %s1051_s16, 3  ;;  %v913_v1 = vld [vmem:[%s1044_s2] ss:$0 sm:$0xff]  ;;  %s647_s25 = sshll.u32 %s1051_s16, 2 }
   0xe   : > { %s908_s22 = scalar_lea.vmem %s1042_s0, %s645_s17  ;;  %s945_s28 = scalar_lea.vmem %s1045_s3, %s647_s25 }
   0xf   : > { %v233_v2 = vld [vmem:[%s908_s22] sm:$0xff]  ;;  %v234_v3 = vld [vmem:[%s908_s22 + $0x8] sm:$0xff]  ;;  %v235_v4 = vld [vmem:[%s908_s22 + $0x10] sm:$0xff] }
  0x10   : > { %v272_v5 = vmul.f32 %v903_v0, %v233_v2  ;;  %v273_v6 = vmul.f32 %v903_v0, %v234_v3  ;;  %v236_v7 = vld [vmem:[%s908_s22 + $0x18] sm:$0xff]  ;;  %v274_v8 = vmul.f32 %v903_v0, %v235_v4  ;;  %v237_v9 = vld [vmem:[%s908_s22 + $0x20] sm:$0xff]  ;;  %v238_v10 = vld [vmem:[%s908_s22 + $0x28] sm:$0xff] }
  0x11   : > { %v275_v11 = vmul.f32 %v903_v0, %v236_v7  ;;  %v276_v12 = vmul.f32 %v903_v0, %v237_v9  ;;  %v277_v13 = vmul.f32 %v903_v0, %v238_v10  ;;  %v239_v14 = vld [vmem:[%s908_s22 + $0x30] sm:$0xff]  ;;  %v240_v15 = vld [vmem:[%s908_s22 + $0x38] sm:$0xff]  ;;  %v241_v24 = vld [vmem:[%s908_s22 + $0x40] sm:$0xff] }
  0x12   : > { %v311_v16 = vadd.f32 %v913_v1, %v272_v5  ;;  %v312_v17 = vadd.f32 %v913_v1, %v273_v6  ;;  %v313_v18 = vadd.f32 %v913_v1, %v274_v8  ;;  %v278_v19 = vmul.f32 %v903_v0, %v239_v14  ;;  %v242_v25 = vld [vmem:[%s908_s22 + $0x48] sm:$0xff]  ;;  %v243_v30 = vld [vmem:[%s908_s22 + $0x50] sm:$0xff]  ;;  %v244_v35 = vld [vmem:[%s908_s22 + $0x58] sm:$0xff] }
  0x13   : > { %v314_v20 = vadd.f32 %v913_v1, %v275_v11  ;;  %v315_v21 = vadd.f32 %v913_v1, %v276_v12  ;;  %v316_v22 = vadd.f32 %v913_v1, %v277_v13  ;;  %v279_v23 = vmul.f32 %v903_v0, %v240_v15  ;;  %v245_v36 = vld [vmem:[%s908_s22 + $0x60] sm:$0xff]  ;;  %v246_v41 = vld [vmem:[%s908_s22 + $0x68] sm:$0xff]  ;;  %v247_v42 = vld [vmem:[%s908_s22 + $0x70] sm:$0xff] }
  0x14   : > { %v343_v26 = vmax.f32 %v311_v16, 0.0  ;;  %v344_v27 = vmax.f32 %v312_v17, 0.0  ;;  %v345_v28 = vmax.f32 %v313_v18, 0.0  ;;  %v317_v29 = vadd.f32 %v913_v1, %v278_v19  ;;  %v248_v51 = vld [vmem:[%s908_s22 + $0x78] sm:$0xff]  ;;  %v249_v56 = vld [vmem:[%s908_s22 + $0x80] sm:$0xff]  ;;  %v250_v61 = vld [vmem:[%s908_s22 + $0x88] sm:$0xff] }
  0x15   : > { %v346_v31 = vmax.f32 %v314_v20, 0.0  ;;  %v347_v32 = vmax.f32 %v315_v21, 0.0  ;;  %v348_v33 = vmax.f32 %v316_v22, 0.0  ;;  %v318_v34 = vadd.f32 %v913_v1, %v279_v23  ;;  %v251_v4 = vld [vmem:[%s908_s22 + $0x90] sm:$0xff]  ;;  %v252_v5 = vld [vmem:[%s908_s22 + $0x98] sm:$0xff]  ;;  %v253_v10 = vld [vmem:[%s908_s22 + $0xa0] sm:$0xff] }
  0x16   : > { %v719_v37 = vpack.c.bf16 %v344_v27, %v343_v26  ;;  %v349_v38 = vmax.f32 %v317_v29, 0.0  ;;  %v280_v39 = vmul.f32 %v903_v0, %v241_v24  ;;  %v281_v40 = vmul.f32 %v903_v0, %v242_v25  ;;  %v254_v15 = vld [vmem:[%s908_s22 + $0xa8] sm:$0xff]  ;;  %v255_v20 = vld [vmem:[%s908_s22 + $0xb0] sm:$0xff]  ;;  %v256_v25 = vld [vmem:[%s908_s22 + $0xb8] sm:$0xff] }
  0x17   : > { %v724_v43 = vpack.c.bf16 %v346_v31, %v345_v28  ;;  %v729_v44 = vpack.c.bf16 %v348_v33, %v347_v32  ;;  %v350_v45 = vmax.f32 %v318_v34, 0.0  ;;  %v282_v46 = vmul.f32 %v903_v0, %v243_v30  ;;  %v257_v30 = vld [vmem:[%s908_s22 + $0xc0] sm:$0xff] }
  0x18   : > { %720 = vst [vmem:[%s945_s28] sm:$0xff] %v719_v37   ;;  %v319_v47 = vadd.f32 %v913_v1, %v280_v39  ;;  %v320_v48 = vadd.f32 %v913_v1, %v281_v40  ;;  %v283_v49 = vmul.f32 %v903_v0, %v244_v35  ;;  %v284_v50 = vmul.f32 %v903_v0, %v245_v36  ;;  %v258_v35 = vld [vmem:[%s908_s22 + $0xc8] sm:$0xff]  ;;  %v259_v40 = vld [vmem:[%s908_s22 + $0xd0] sm:$0xff] }
  0x19   : > { %796 = vst [vmem:[%s945_s28 + $0x8] sm:$0xff] %v724_v43   ;;  %797 = vst [vmem:[%s945_s28 + $0x10] sm:$0xff] %v729_v44   ;;  %v734_v52 = vpack.c.bf16 %v350_v45, %v349_v38  ;;  %v321_v53 = vadd.f32 %v913_v1, %v282_v46  ;;  %v285_v54 = vmul.f32 %v903_v0, %v246_v41  ;;  %v260_v41 = vld [vmem:[%s908_s22 + $0xd8] sm:$0xff]  ;;  %v261_v46 = vld [vmem:[%s908_s22 + $0xe0] sm:$0xff] }
  0x1a   : > { %v286_v55 = vmul.f32 %v903_v0, %v247_v42  ;;  %v351_v57 = vmax.f32 %v319_v47, 0.0  ;;  %v352_v58 = vmax.f32 %v320_v48, 0.0  ;;  %v322_v59 = vadd.f32 %v913_v1, %v283_v49 }
  0x1b   : > { %v323_v60 = vadd.f32 %v913_v1, %v284_v50  ;;  %798 = vst [vmem:[%s945_s28 + $0x18] sm:$0xff] %v734_v52   ;;  %v353_v62 = vmax.f32 %v321_v53, 0.0  ;;  %v324_v63 = vadd.f32 %v913_v1, %v285_v54  ;;  %v287_v2 = vmul.f32 %v903_v0, %v248_v51  ;;  %v262_v51 = vld [vmem:[%s908_s22 + $0xe8] sm:$0xff] }
  0x1c   : > { %v325_v3 = vadd.f32 %v913_v1, %v286_v55  ;;  %v739_v6 = vpack.c.bf16 %v352_v58, %v351_v57  ;;  %v354_v7 = vmax.f32 %v322_v59, 0.0  ;;  %v288_v9 = vmul.f32 %v903_v0, %v249_v56  ;;  %v263_v56 = vld [vmem:[%s908_s22 + $0xf0] sm:$0xff] }
  0x1d   : > { %v355_v8 = vmax.f32 %v323_v60, 0.0  ;;  %v356_v11 = vmax.f32 %v324_v63, 0.0  ;;  %v326_v12 = vadd.f32 %v913_v1, %v287_v2  ;;  %v289_v14 = vmul.f32 %v903_v0, %v250_v61  ;;  %v264_v61 = vld [vmem:[%s908_s22 + $0xf8] sm:$0xff] }
  0x1e   : > { %v357_v13 = vmax.f32 %v325_v3, 0.0  ;;  %799 = vst [vmem:[%s945_s28 + $0x20] sm:$0xff] %v739_v6   ;;  %v744_v16 = vpack.c.bf16 %v354_v7, %v353_v62  ;;  %v327_v17 = vadd.f32 %v913_v1, %v288_v9  ;;  %v290_v18 = vmul.f32 %v903_v0, %v251_v4 }
  0x1f   : > { %v291_v19 = vmul.f32 %v903_v0, %v252_v5  ;;  %v749_v21 = vpack.c.bf16 %v356_v11, %v355_v8  ;;  %v358_v22 = vmax.f32 %v326_v12, 0.0  ;;  %v328_v23 = vadd.f32 %v913_v1, %v289_v14 }
  0x20   : > { %v292_v24 = vmul.f32 %v903_v0, %v253_v10  ;;  %800 = vst [vmem:[%s945_s28 + $0x28] sm:$0xff] %v744_v16   ;;  %v359_v26 = vmax.f32 %v327_v17, 0.0  ;;  %v329_v27 = vadd.f32 %v913_v1, %v290_v18  ;;  %v293_v29 = vmul.f32 %v903_v0, %v254_v15 }
  0x21   : > { %v330_v28 = vadd.f32 %v913_v1, %v291_v19  ;;  %801 = vst [vmem:[%s945_s28 + $0x30] sm:$0xff] %v749_v21   ;;  %v754_v31 = vpack.c.bf16 %v358_v22, %v357_v13  ;;  %v360_v32 = vmax.f32 %v328_v23, 0.0  ;;  %v294_v34 = vmul.f32 %v903_v0, %v255_v20 }
  0x22   : > { %v331_v33 = vadd.f32 %v913_v1, %v292_v24  ;;  %v361_v36 = vmax.f32 %v329_v27, 0.0  ;;  %v332_v38 = vadd.f32 %v913_v1, %v293_v29  ;;  %v295_v39 = vmul.f32 %v903_v0, %v256_v25 }
  0x23   : > { %v362_v37 = vmax.f32 %v330_v28, 0.0  ;;  %802 = vst [vmem:[%s945_s28 + $0x38] sm:$0xff] %v754_v31   ;;  %v759_v42 = vpack.c.bf16 %v360_v32, %v359_v26  ;;  %v333_v44 = vadd.f32 %v913_v1, %v294_v34  ;;  %v296_v45 = vmul.f32 %v903_v0, %v257_v30 }
  0x24   : > { %v363_v43 = vmax.f32 %v331_v33, 0.0  ;;  %v364_v48 = vmax.f32 %v332_v38, 0.0  ;;  %v334_v49 = vadd.f32 %v913_v1, %v295_v39  ;;  %v297_v50 = vmul.f32 %v903_v0, %v258_v35 }
  0x25   : > { %v764_v47 = vpack.c.bf16 %v362_v37, %v361_v36  ;;  %803 = vst [vmem:[%s945_s28 + $0x40] sm:$0xff] %v759_v42   ;;  %v365_v52 = vmax.f32 %v333_v44, 0.0  ;;  %v335_v53 = vadd.f32 %v913_v1, %v296_v45  ;;  %v298_v54 = vmul.f32 %v903_v0, %v259_v40 }
  0x26   : > { %v299_v55 = vmul.f32 %v903_v0, %v260_v41  ;;  %v769_v57 = vpack.c.bf16 %v364_v48, %v363_v43  ;;  %v366_v58 = vmax.f32 %v334_v49, 0.0  ;;  %v336_v59 = vadd.f32 %v913_v1, %v297_v50 }
  0x27   : > { %804 = vst [vmem:[%s945_s28 + $0x48] sm:$0xff] %v764_v47   ;;  %v300_v60 = vmul.f32 %v903_v0, %v261_v46  ;;  %v367_v62 = vmax.f32 %v335_v53, 0.0  ;;  %v337_v63 = vadd.f32 %v913_v1, %v298_v54  ;;  %v301_v3 = vmul.f32 %v903_v0, %v262_v51 }
  0x28   : > { %v338_v2 = vadd.f32 %v913_v1, %v299_v55  ;;  %805 = vst [vmem:[%s945_s28 + $0x50] sm:$0xff] %v769_v57   ;;  %v774_v4 = vpack.c.bf16 %v366_v58, %v365_v52  ;;  %v368_v5 = vmax.f32 %v336_v59, 0.0  ;;  %v302_v7 = vmul.f32 %v903_v0, %v263_v56 }
  0x29   : > { %v339_v6 = vadd.f32 %v913_v1, %v300_v60  ;;  %v369_v8 = vmax.f32 %v337_v63, 0.0  ;;  %v340_v10 = vadd.f32 %v913_v1, %v301_v3  ;;  %v303_v11 = vmul.f32 %v903_v0, %v264_v61 }
  0x2a   : > { %v370_v9 = vmax.f32 %v338_v2, 0.0  ;;  %806 = vst [vmem:[%s945_s28 + $0x58] sm:$0xff] %v774_v4   ;;  %v779_v12 = vpack.c.bf16 %v368_v5, %v367_v62  ;;  %v341_v14 = vadd.f32 %v913_v1, %v302_v7 }
  0x2b   : > { %v371_v13 = vmax.f32 %v339_v6, 0.0  ;;  %v372_v16 = vmax.f32 %v340_v10, 0.0  ;;  %v342_v17 = vadd.f32 %v913_v1, %v303_v11 }
  0x2c   : > { %v784_v15 = vpack.c.bf16 %v370_v9, %v369_v8  ;;  %807 = vst [vmem:[%s945_s28 + $0x60] sm:$0xff] %v779_v12   ;;  %v373_v18 = vmax.f32 %v341_v14, 0.0 }
  0x2d   : > { %v789_v19 = vpack.c.bf16 %v372_v16, %v371_v13  ;;  %v374_v20 = vmax.f32 %v342_v17, 0.0 }
  0x2e   : > { %808 = vst [vmem:[%s945_s28 + $0x68] sm:$0xff] %v784_v15  }
  0x2f   : > { %809 = vst [vmem:[%s945_s28 + $0x70] sm:$0xff] %v789_v19   ;;  %v794_v21 = vpack.c.bf16 %v374_v20, %v373_v18 }
  0x31   : > { %810 = vst [vmem:[%s945_s28 + $0x78] sm:$0xff] %v794_v21  }
  0x32 PF: > { %s13_s14 = sadd.s32 1, %s857_s14   ;;  %s1046_s12 = smov %s853_s13 }
  0x33   : > { %p10_p5 = scmp.ge.s32.totalorder %s13_s14, 4   ;;  %s1047_s13 = smov %s1049_s15 }
  0x35   :  { %12 = sbr.rel (!%p10_p5) target bundleno = 2 (0x2), region = 68 }

// kernel: stack_decoder_forward.6
= control target key start
LH: loop header
LB: loop body
LE: loop exit
PB: predicated region body
PF: predicated region fallthrough
CT: control target
= control target key end

     0   :  { %s1530_s12 = smov 0   ;;  %s1532_s13 = smov 0   ;;  %s1784_s0 = inlined_call_operand.vmem [shape: bf16[512,256], index: 0, kind: input, shape index: {}]   ;;  %s1785_s1 = inlined_call_operand.vmem [shape: bf16[256,128], index: 1, kind: input, shape index: {}]   ;;  %s1786_s2 = inlined_call_operand.vmem [shape: f32[512,128], index: 2, kind: output, shape index: {0}]   ;;  %s1787_s3 = inlined_call_operand.vmem [shape: f32[16,128], index: 3, kind: output, shape index: {1}]  }
   0x1   :  { %s1534_s14 = smov 0  }
   0x2 LB: > { %s33_s15 = sadd.s32 1, %s1504_s13  ;;  %p1212_p0 = scmp.ge.s32.totalorder %s1508_s14, 1  ;;  %s1508_s14 = sphi %s1534_s14, %s14_s14   ;;  %s1504_s13 = sphi %s1532_s13, %s1789_s13   ;;  %s1500_s12 = sphi %s1530_s12, %s1788_s12  }
   0x3   : > { %p35_p1 = scmp.ge.s32.totalorder %s33_s15, 2  ;;  %p188_p2 = scmp.lt.s32.totalorder %s1508_s14, 3 }
   0x5   : > { %s1791_s15 = smov (%p35_p1, %s33_s15), 0  ;;  %p189_p3 = pnand %p1212_p0, %p188_p2 }
   0x6   : > { %s1213_s18 = sshll.u32 (!%p189_p3), %s1500_s12, 5  ;;  %p265_p5 = scmp.lt.s32.totalorder (!%p189_p3), %s1500_s12, 1 }
   0x7   : > { %192 = sbr.rel (%p189_p3) target bundleno = 353 (0x161), region = 28  ;;  %p237_p4 = scmp.lt.s32.totalorder (!%p189_p3), %s1213_s18, 63 }
   0xc   : > { %v1422_v0 = vld [vmem:[%s1785_s1 + $0x78] sm:$0xff]   ;;  %v1424_v2 = vld [vmem:[%s1785_s1 + $0x70] sm:$0xff]   ;;  %v1426_v4 = vld [vmem:[%s1785_s1 + $0x68] sm:$0xff]   ;;  %s1793_s18 = smov (!%p237_p4, %s1213_s18), 63  ;;  %s1795_s12 = smov (!%p265_p5, %s1500_s12), 1  ;;  %vm1059_vm0 = vcmask 1040384  }
   0xd   : > { %v1423_v1 = vld [vmem:[%s1785_s1 + $0x38] sm:$0xff]   ;;  %1270 = vmatprep.subr.bf16.mxu0 %v1422_v0  ;;  %1382 = vmatprep.subr.bf16.mxu1 %v1422_v0  ;;  %v1425_v3 = vld [vmem:[%s1785_s1 + $0x30] sm:$0xff]   ;;  %v1427_v5 = vld [vmem:[%s1785_s1 + $0x28] sm:$0xff]   ;;  %s1269_s6 = sshll.u32 %s1793_s18, 3  ;;  %s1218_s18 = sshll.u32 %s1795_s12, 3  ;;  %vm1061_vm1 = vcmask 1041408  }
   0xe   : > { %1271 = vmatpush3.bf16.msra.mxu0 %v1423_v1  ;;  %1390 = vmatpush3.bf16.msra.mxu1 %v1423_v1  ;;  %v1428_v6 = vld [vmem:[%s1785_s1 + $0x60] sm:$0xff]   ;;  %v1430_v8 = vld [vmem:[%s1785_s1 + $0x58] sm:$0xff]   ;;  %s1586_s11 = scalar_lea.vmem %s1784_s0, %s1269_s6  ;;  %v1432_v10 = vld [vmem:[%s1785_s1 + $0x50] sm:$0xff]   ;;  %s1646_s7 = scalar_lea.vmem %s1786_s2, %s1269_s6 }
   0xf   : > { %1272 = vmatprep.subr.bf16.mxu0 %v1424_v2  ;;  %1383 = vmatprep.subr.bf16.mxu1 %v1424_v2  ;;  %v1429_v7 = vld [vmem:[%s1785_s1 + $0x20] sm:$0xff]   ;;  %v1431_v9 = vld [vmem:[%s1785_s1 + $0x18] sm:$0xff]   ;;  %v1433_v12 = vld [vmem:[%s1785_s1 + $0x10] sm:$0xff]   ;;  %s271_s9 = scalar_lea.vmem %s1787_s3, %s1218_s18 }
  0x10   : > { %v1440_v11 = vld [vmem:[%s1586_s11 + $0x4] ss:$8 sps:$4 sm:$0xff]   ;;  %v1438_v18 = vld [vmem:[%s1586_s11] ss:$8 sps:$4 sm:$0xff]   ;;  %v1441_v19 = vld [vmem:[%s1586_s11 + $0x14] ss:$8 sps:$4 sm:$0xff]  }
  0x11   : > { %693 = vmatprep.mubr.bf16.mxu0 %v1440_v11  ;;  %v1434_v13 = vld [vmem:[%s1785_s1 + $0x48] sm:$0xff]   ;;  %v1436_v16 = vld [vmem:[%s1785_s1 + $0x40] sm:$0xff]   ;;  %v1456_v21 = vld [vmem:[%s1586_s11 + $0x94] ss:$8 sps:$4 sm:$0xff]  }
  0x12   : > { %1273 = vmatpush3.bf16.msra.mxu0 %v1425_v3  ;;  %1391 = vmatpush3.bf16.msra.mxu1 %v1425_v3  ;;  %v1452_v14 = vld [vmem:[%s1586_s11 + $0x84] ss:$8 sps:$4 sm:$0xff]   ;;  %v1450_v20 = vld [vmem:[%s1586_s11 + $0x80] ss:$8 sps:$4 sm:$0xff]   ;;  %v1443_v22 = vld [vmem:[%s1586_s11 + $0x10] ss:$8 sps:$4 sm:$0xff]  }
  0x13   : > { %1274 = vmatprep.subr.bf16.mxu0 %v1426_v4  ;;  %1384 = vmatprep.subr.bf16.mxu1 %v1426_v4  ;;  %v1435_v15 = vld [vmem:[%s1785_s1 + $0x8] sm:$0xff]   ;;  %v1437_v17 = vld [vmem:[%s1785_s1] sm:$0xff]   ;;  %v1458_v24 = vld [vmem:[%s1586_s11 + $0x90] ss:$8 sps:$4 sm:$0xff]  }
  0x14   : > { %757 = vmatprep.mubr.bf16.mxu1 %v1452_v14  ;;  %v1444_v23 = vld [vmem:[%s1586_s11 + $0x24] ss:$8 sps:$4 sm:$0xff]   ;;  %v1446_v26 = vld [vmem:[%s1586_s11 + $0x20] ss:$8 sps:$4 sm:$0xff]   ;;  %v1447_v27 = vld [vmem:[%s1586_s11 + $0x34] ss:$8 sps:$4 sm:$0xff]  }
  0x15   : > { %v1462_v25 = vld [vmem:[%s1586_s11 + $0xa4] ss:$8 sps:$4 sm:$0xff]   ;;  %v1464_v28 = vld [vmem:[%s1586_s11 + $0xa0] ss:$8 sps:$4 sm:$0xff]   ;;  %v1468_v29 = vld [vmem:[%s1586_s11 + $0xb4] ss:$8 sps:$4 sm:$0xff]  }
  0x16   : > { %1275 = vmatpush3.bf16.msra.mxu0 %v1427_v5  ;;  %1392 = vmatpush3.bf16.msra.mxu1 %v1427_v5  ;;  %v1449_v30 = vld [vmem:[%s1586_s11 + $0x30] ss:$8 sps:$4 sm:$0xff]   ;;  %v1453_v31 = vld [vmem:[%s1586_s11 + $0x44] ss:$8 sps:$4 sm:$0xff]   ;;  %v1455_v34 = vld [vmem:[%s1586_s11 + $0x40] ss:$8 sps:$4 sm:$0xff]  }
  0x17   : > { %1276 = vmatprep.subr.bf16.mxu0 %v1428_v6  ;;  %1385 = vmatprep.subr.bf16.mxu1 %v1428_v6  ;;  %v1470_v32 = vld [vmem:[%s1586_s11 + $0xb0] ss:$8 sps:$4 sm:$0xff]   ;;  %v1474_v33 = vld [vmem:[%s1586_s11 + $0xc4] ss:$8 sps:$4 sm:$0xff]   ;;  %v1459_v35 = vld [vmem:[%s1586_s11 + $0x54] ss:$8 sps:$4 sm:$0xff]  }
  0x18   : > { %v1476_v36 = vld [vmem:[%s1586_s11 + $0xc0] ss:$8 sps:$4 sm:$0xff]   ;;  %v1477_v37 = vld [vmem:[%s1586_s11 + $0xd4] ss:$8 sps:$4 sm:$0xff]   ;;  %v1461_v38 = vld [vmem:[%s1586_s11 + $0x50] ss:$8 sps:$4 sm:$0xff]  }
  0x19   : > { %v1465_v39 = vld [vmem:[%s1586_s11 + $0x64] ss:$8 sps:$4 sm:$0xff]   ;;  %v1479_v40 = vld [vmem:[%s1586_s11 + $0xd0] ss:$8 sps:$4 sm:$0xff]   ;;  %v1467_v42 = vld [vmem:[%s1586_s11 + $0x60] ss:$8 sps:$4 sm:$0xff]  }
  0x1a   : > { %1277 = vmatpush3.bf16.msra.mxu0 %v1429_v7  ;;  %1393 = vmatpush3.bf16.msra.mxu1 %v1429_v7  ;;  %v1480_v41 = vld [vmem:[%s1586_s11 + $0xe4] ss:$8 sps:$4 sm:$0xff]   ;;  %v1471_v43 = vld [vmem:[%s1586_s11 + $0x74] ss:$8 sps:$4 sm:$0xff]   ;;  %v1482_v44 = vld [vmem:[%s1586_s11 + $0xe0] ss:$8 sps:$4 sm:$0xff]  }
  0x1b   : > { %1278 = vmatprep.subr.bf16.mxu0 %v1430_v8  ;;  %1386 = vmatprep.subr.bf16.mxu1 %v1430_v8  ;;  %v1483_v45 = vld [vmem:[%s1586_s11 + $0xf4] ss:$8 sps:$4 sm:$0xff]   ;;  %v1473_v46 = vld [vmem:[%s1586_s11 + $0x70] ss:$8 sps:$4 sm:$0xff]  }
  0x1c   : > { %v1485_v47 = vld [vmem:[%s1586_s11 + $0xf0] ss:$8 sps:$4 sm:$0xff]  }
  0x1e   : > { %1279 = vmatpush3.bf16.msra.mxu0 %v1431_v9  ;;  %1394 = vmatpush3.bf16.msra.mxu1 %v1431_v9 }
  0x1f   : > { %1280 = vmatprep.subr.bf16.mxu0 %v1432_v10  ;;  %1387 = vmatprep.subr.bf16.mxu1 %v1432_v10 }
  0x22   : > { %1281 = vmatpush3.bf16.msra.mxu0 %v1433_v12  ;;  %1395 = vmatpush3.bf16.msra.mxu1 %v1433_v12 }
  0x23   : > { %1282 = vmatprep.subr.bf16.mxu0 %v1434_v13  ;;  %1388 = vmatprep.subr.bf16.mxu1 %v1434_v13 }
  0x26   : > { %1283 = vmatpush3.bf16.msra.mxu0 %v1435_v15  ;;  %1396 = vmatpush3.bf16.msra.mxu1 %v1435_v15 }
  0x27   : > { %1284 = vmatprep.subr.bf16.mxu0 %v1436_v16  ;;  %1389 = vmatprep.subr.bf16.mxu1 %v1436_v16 }
  0x2a   : > { %1285 = vmatpush3.bf16.msra.mxu0 %v1437_v17  ;;  %1397 = vmatpush3.bf16.msra.mxu1 %v1437_v17 }
  0x2d   : > { %694 = vmatmul.mubr.bf16.vlgmr.msra.gmra.mxu0 %v1438_v18  ;;  %758 = vmatmul.mubr.bf16.vlgmr.msra.gmra.mxu1 %v1450_v20 }
  0x2e   : > { %701 = vmatprep.mubr.bf16.mxu0 %v1441_v19  ;;  %765 = vmatprep.mubr.bf16.mxu1 %v1456_v21 }
  0x35   : > { %702 = vmatmul.mubr.bf16.gmra.mxu0 %v1443_v22  ;;  %766 = vmatmul.mubr.bf16.gmra.mxu1 %v1458_v24 }
  0x36   : > { %709 = vmatprep.mubr.bf16.mxu0 %v1444_v23  ;;  %773 = vmatprep.mubr.bf16.mxu1 %v1462_v25 }
  0x3d   : > { %710 = vmatmul.mubr.bf16.gmra.mxu0 %v1446_v26  ;;  %774 = vmatmul.mubr.bf16.gmra.mxu1 %v1464_v28 }
  0x3e   : > { %717 = vmatprep.mubr.bf16.mxu0 %v1447_v27  ;;  %781 = vmatprep.mubr.bf16.mxu1 %v1468_v29 }
  0x45   : > { %718 = vmatmul.mubr.bf16.gmra.mxu0 %v1449_v30  ;;  %782 = vmatmul.mubr.bf16.gmra.mxu1 %v1470_v32 }
  0x46   : > { %725 = vmatprep.mubr.bf16.mxu0 %v1453_v31  ;;  %789 = vmatprep.mubr.bf16.mxu1 %v1474_v33 }
  0x4d   : > { %726 = vmatmul.mubr.bf16.gmra.mxu0 %v1455_v34  ;;  %790 = vmatmul.mubr.bf16.gmra.mxu1 %v1476_v36 }
  0x4e   : > { %733 = vmatprep.mubr.bf16.mxu0 %v1459_v35  ;;  %797 = vmatprep.mubr.bf16.mxu1 %v1477_v37 }
  0x55   : > { %734 = vmatmul.mubr.bf16.gmra.mxu0 %v1461_v38  ;;  %798 = vmatmul.mubr.bf16.gmra.mxu1 %v1479_v40 }
  0x56   : > { %741 = vmatprep.mubr.bf16.mxu0 %v1465_v39  ;;  %805 = vmatprep.mubr.bf16.mxu1 %v1480_v41 }
  0x5d   : > { %742 = vmatmul.mubr.bf16.gmra.mxu0 %v1467_v42  ;;  %806 = vmatmul.mubr.bf16.gmra.mxu1 %v1482_v44 }
  0x5e   : > { %749 = vmatprep.mubr.bf16.mxu0 %v1471_v43  ;;  %813 = vmatprep.mubr.bf16.mxu1 %v1483_v45 }
  0x65   : > { %750 = vmatmul.mubr.bf16.gmra.mxu0 %v1473_v46  ;;  %814 = vmatmul.mubr.bf16.gmra.mxu1 %v1485_v47 }
  0xed   : > { %v1286_v48 = vpop.f32.mrf.mxu0  ;;  %v1334_v49 = vpop.f32.mrf.mxu1 }
  0xef   : > { %v1287_v50 = vpop.f32.mrf.mxu0  ;;  %v1335_v52 = vpop.f32.mrf.mxu1 }
  0xf0   : > { %v1648_v51 = vadd.f32 %v1287_v50, %v1286_v48  ;;  %v1650_v54 = vadd.f32 %v1335_v52, %v1334_v49 }
  0xf1   : > { %v1289_v53 = vpop.f32.mrf.mxu0  ;;  %v1337_v55 = vpop.f32.mrf.mxu1 }
  0xf2   : > { %921 = vst [vmem:[%s1646_s7] sm:$0xff] %v1648_v51  ;;  %937 = vst [vmem:[%s1646_s7 + $0x80] sm:$0xff] %v1650_v54  ;;  %v990_v40 = vmul.f32 %v1648_v51, %v1648_v51 }
  0xf3   : > { %v1290_v56 = vpop.f32.mrf.mxu0  ;;  %v1338_v58 = vpop.f32.mrf.mxu1 }
  0xf4   : > { %v1291_v57 = vadd.f32 %v1290_v56, %v1289_v53  ;;  %v1656_v60 = vadd.f32 %v1338_v58, %v1337_v55 }
  0xf5   : > { %v1292_v59 = vpop.f32.mrf.mxu0  ;;  %v1340_v61 = vpop.f32.mrf.mxu1 }
  0xf6   : > { %922 = vst [vmem:[%s1646_s7 + $0x8] sm:$0xff] %v1291_v57  ;;  %938 = vst [vmem:[%s1646_s7 + $0x88] sm:$0xff] %v1656_v60  ;;  %v991_v35 = vmul.f32 %v1291_v57, %v1291_v57  ;;  %v953_v41 = vadd.f32 %v1291_v57, %v1648_v51 }
  0xf7   : > { %v1293_v62 = vpop.f32.mrf.mxu0  ;;  %v1341_v0 = vpop.f32.mrf.mxu1 }
  0xf8   : > { %v1294_v63 = vadd.f32 %v1293_v62, %v1292_v59  ;;  %v1661_v2 = vadd.f32 %v1341_v0, %v1340_v61  ;;  %v1022_v45 = vadd.f32 %v991_v35, %v990_v40 }
  0xf9   : > { %v1295_v1 = vpop.f32.mrf.mxu0  ;;  %v1343_v3 = vpop.f32.mrf.mxu1 }
  0xfa   : > { %923 = vst [vmem:[%s1646_s7 + $0x10] sm:$0xff] %v1294_v63  ;;  %939 = vst [vmem:[%s1646_s7 + $0x90] sm:$0xff] %v1661_v2  ;;  %v992_v42 = vmul.f32 %v1294_v63, %v1294_v63  ;;  %v954_v46 = vadd.f32 %v1294_v63, %v953_v41 }
  0xfb   : > { %v1296_v4 = vpop.f32.mrf.mxu0  ;;  %v1344_v6 = vpop.f32.mrf.mxu1 }
  0xfc   : > { %v1297_v5 = vadd.f32 %v1296_v4, %v1295_v1  ;;  %v1666_v8 = vadd.f32 %v1344_v6, %v1343_v3  ;;  %v1023_v53 = vadd.f32 %v1022_v45, %v992_v42 }
  0xfd   : > { %v1298_v7 = vpop.f32.mrf.mxu0  ;;  %v1346_v9 = vpop.f32.mrf.mxu1 }
  0xfe   : > { %924 = vst [vmem:[%s1646_s7 + $0x18] sm:$0xff] %v1297_v5  ;;  %940 = vst [vmem:[%s1646_s7 + $0x98] sm:$0xff] %v1666_v8  ;;  %v993_v47 = vmul.f32 %v1297_v5, %v1297_v5  ;;  %v955_v55 = vadd.f32 %v1297_v5, %v954_v46 }
  0xff   : > { %v1299_v10 = vpop.f32.mrf.mxu0  ;;  %v1347_v12 = vpop.f32.mrf.mxu1 }
 0x100   : > { %v1300_v11 = vadd.f32 %v1299_v10, %v1298_v7  ;;  %v1671_v14 = vadd.f32 %v1347_v12, %v1346_v9  ;;  %v1024_v58 = vadd.f32 %v1023_v53, %v993_v47 }
 0x101   : > { %v1301_v13 = vpop.f32.mrf.mxu0  ;;  %v1349_v15 = vpop.f32.mrf.mxu1 }
 0x102   : > { %925 = vst [vmem:[%s1646_s7 + $0x20] sm:$0xff] %v1300_v11  ;;  %941 = vst [vmem:[%s1646_s7 + $0xa0] sm:$0xff] %v1671_v14  ;;  %v994_v51 = vmul.f32 %v1300_v11, %v1300_v11  ;;  %v956_v59 = vadd.f32 %v1300_v11, %v955_v55 }
 0x103   : > { %v1302_v16 = vpop.f32.mrf.mxu0  ;;  %v1350_v18 = vpop.f32.mrf.mxu1 }
 0x104   : > { %v1303_v17 = vadd.f32 %v1302_v16, %v1301_v13  ;;  %v1676_v20 = vadd.f32 %v1350_v18, %v1349_v15  ;;  %v1025_v3 = vadd.f32 %v1024_v58, %v994_v51 }
 0x105   : > { %v1304_v19 = vpop.f32.mrf.mxu0  ;;  %v1352_v21 = vpop.f32.mrf.mxu1 }
 0x106   : > { %926 = vst [vmem:[%s1646_s7 + $0x28] sm:$0xff] %v1303_v17  ;;  %942 = vst [vmem:[%s1646_s7 + $0xa8] sm:$0xff] %v1676_v20  ;;  %v995_v61 = vmul.f32 %v1303_v17, %v1303_v17  ;;  %v957_v4 = vadd.f32 %v1303_v17, %v956_v59 }
 0x107   : > { %v1305_v22 = vpop.f32.mrf.mxu0  ;;  %v1353_v24 = vpop.f32.mrf.mxu1 }
 0x108   : > { %v1306_v23 = vadd.f32 %v1305_v22, %v1304_v19  ;;  %v1681_v26 = vadd.f32 %v1353_v24, %v1352_v21  ;;  %v1026_v9 = vadd.f32 %v1025_v3, %v995_v61 }
 0x109   : > { %v1307_v25 = vpop.f32.mrf.mxu0  ;;  %v1355_v27 = vpop.f32.mrf.mxu1 }
 0x10a   : > { %927 = vst [vmem:[%s1646_s7 + $0x30] sm:$0xff] %v1306_v23  ;;  %943 = vst [vmem:[%s1646_s7 + $0xb0] sm:$0xff] %v1681_v26  ;;  %v996_v5 = vmul.f32 %v1306_v23, %v1306_v23  ;;  %v958_v10 = vadd.f32 %v1306_v23, %v957_v4 }
 0x10b   : > { %v1308_v28 = vpop.f32.mrf.mxu0  ;;  %v1356_v30 = vpop.f32.mrf.mxu1 }
 0x10c   : > { %v1309_v29 = vadd.f32 %v1308_v28, %v1307_v25  ;;  %v1686_v32 = vadd.f32 %v1356_v30, %v1355_v27  ;;  %v1027_v18 = vadd.f32 %v1026_v9, %v996_v5 }
 0x10d   : > { %v1310_v31 = vpop.f32.mrf.mxu0  ;;  %v1358_v33 = vpop.f32.mrf.mxu1 }
 0x10e   : > { %928 = vst [vmem:[%s1646_s7 + $0x38] sm:$0xff] %v1309_v29  ;;  %944 = vst [vmem:[%s1646_s7 + $0xb8] sm:$0xff] %v1686_v32  ;;  %v997_v12 = vmul.f32 %v1309_v29, %v1309_v29  ;;  %v959_v19 = vadd.f32 %v1309_v29, %v958_v10 }
 0x10f   : > { %v1311_v34 = vpop.f32.mrf.mxu0  ;;  %v1359_v37 = vpop.f32.mrf.mxu1 }
 0x110   : > { %v1312_v36 = vadd.f32 %v1311_v34, %v1310_v31  ;;  %v1691_v39 = vadd.f32 %v1359_v37, %v1358_v33  ;;  %v1028_v24 = vadd.f32 %v1027_v18, %v997_v12  ;;  %v1007_v18 = vmul.f32 %v1656_v60, %v1656_v60 }
 0x111   : > { %v1313_v38 = vpop.f32.mrf.mxu0  ;;  %v1361_v43 = vpop.f32.mrf.mxu1 }
 0x112   : > { %929 = vst [vmem:[%s1646_s7 + $0x40] sm:$0xff] %v1312_v36  ;;  %945 = vst [vmem:[%s1646_s7 + $0xc0] sm:$0xff] %v1691_v39  ;;  %v998_v17 = vmul.f32 %v1312_v36, %v1312_v36  ;;  %v960_v25 = vadd.f32 %v1312_v36, %v959_v19 }
 0x113   : > { %v1314_v44 = vpop.f32.mrf.mxu0  ;;  %v1362_v49 = vpop.f32.mrf.mxu1 }
 0x114   : > { %v1315_v48 = vadd.f32 %v1314_v44, %v1313_v38  ;;  %v1699_v52 = vadd.f32 %v1362_v49, %v1361_v43  ;;  %v1029_v33 = vadd.f32 %v1028_v24, %v998_v17 }
 0x115   : > { %v1316_v50 = vpop.f32.mrf.mxu0  ;;  %v1364_v56 = vpop.f32.mrf.mxu1 }
 0x116   : > { %930 = vst [vmem:[%s1646_s7 + $0x48] sm:$0xff] %v1315_v48  ;;  %946 = vst [vmem:[%s1646_s7 + $0xc8] sm:$0xff] %v1699_v52  ;;  %v999_v27 = vmul.f32 %v1315_v48, %v1315_v48  ;;  %v961_v34 = vadd.f32 %v1315_v48, %v960_v25  ;;  %v1009_v25 = vmul.f32 %v1666_v8, %v1666_v8 }
 0x117   : > { %v1317_v57 = vpop.f32.mrf.mxu0  ;;  %v1365_v63 = vpop.f32.mrf.mxu1 }
 0x118   : > { %v1318_v62 = vadd.f32 %v1317_v57, %v1316_v50  ;;  %v1704_v1 = vadd.f32 %v1365_v63, %v1364_v56  ;;  %v1030_v38 = vadd.f32 %v1029_v33, %v999_v27 }
 0x119   : > { %v1319_v0 = vpop.f32.mrf.mxu0  ;;  %v1367_v6 = vpop.f32.mrf.mxu1 }
 0x11a   : > { %931 = vst [vmem:[%s1646_s7 + $0x50] sm:$0xff] %v1318_v62  ;;  %947 = vst [vmem:[%s1646_s7 + $0xd0] sm:$0xff] %v1704_v1  ;;  %v1000_v29 = vmul.f32 %v1318_v62, %v1318_v62  ;;  %v962_v40 = vadd.f32 %v1318_v62, %v961_v34 }
 0x11b   : > { %v1320_v7 = vpop.f32.mrf.mxu0  ;;  %v1368_v13 = vpop.f32.mrf.mxu1 }
 0x11c   : > { %v1321_v11 = vadd.f32 %v1320_v7, %v1319_v0  ;;  %v1709_v16 = vadd.f32 %v1368_v13, %v1367_v6  ;;  %v1031_v45 = vadd.f32 %v1030_v38, %v1000_v29 }
 0x11d   : > { %v1322_v15 = vpop.f32.mrf.mxu0  ;;  %v1370_v21 = vpop.f32.mrf.mxu1 }
 0x11e   : > { %932 = vst [vmem:[%s1646_s7 + $0x58] sm:$0xff] %v1321_v11  ;;  %948 = vst [vmem:[%s1646_s7 + $0xd8] sm:$0xff] %v1709_v16  ;;  %v1001_v41 = vmul.f32 %v1321_v11, %v1321_v11  ;;  %v963_v46 = vadd.f32 %v1321_v11, %v962_v40  ;;  %v1006_v11 = vmul.f32 %v1650_v54, %v1650_v54 }
 0x11f   : > { %v1323_v22 = vpop.f32.mrf.mxu0  ;;  %v1371_v28 = vpop.f32.mrf.mxu1 }
 0x120   : > { %v1324_v23 = vadd.f32 %v1323_v22, %v1322_v15  ;;  %v1714_v31 = vadd.f32 %v1371_v28, %v1370_v21  ;;  %v1032_v50 = vadd.f32 %v1031_v45, %v1001_v41  ;;  %v1008_v21 = vmul.f32 %v1661_v2, %v1661_v2 }
 0x121   : > { %v1325_v30 = vpop.f32.mrf.mxu0  ;;  %v1373_v35 = vpop.f32.mrf.mxu1  ;;  %v1016_v45 = vmul.f32 %v1704_v1, %v1704_v1 }
 0x122   : > { %933 = vst [vmem:[%s1646_s7 + $0x60] sm:$0xff] %v1324_v23  ;;  %949 = vst [vmem:[%s1646_s7 + $0xe0] sm:$0xff] %v1714_v31  ;;  %v1002_v47 = vmul.f32 %v1324_v23, %v1324_v23  ;;  %v964_v53 = vadd.f32 %v1324_v23, %v963_v46 }
 0x123   : > { %v1326_v37 = vpop.f32.mrf.mxu0  ;;  %v1374_v42 = vpop.f32.mrf.mxu1 }
 0x124   : > { %v1327_v36 = vadd.f32 %v1326_v37, %v1325_v30  ;;  %v1719_v44 = vadd.f32 %v1374_v42, %v1373_v35  ;;  %v1033_v59 = vadd.f32 %v1032_v50, %v1002_v47 }
 0x125   : > { %v1328_v43 = vpop.f32.mrf.mxu0  ;;  %v1376_v48 = vpop.f32.mrf.mxu1 }
 0x126   : > { %934 = vst [vmem:[%s1646_s7 + $0x68] sm:$0xff] %v1327_v36  ;;  %950 = vst [vmem:[%s1646_s7 + $0xe8] sm:$0xff] %v1719_v44  ;;  %v1003_v55 = vmul.f32 %v1327_v36, %v1327_v36  ;;  %v965_v61 = vadd.f32 %v1327_v36, %v964_v53  ;;  %v1015_v36 = vmul.f32 %v1699_v52, %v1699_v52 }
 0x127   : > { %v1329_v49 = vpop.f32.mrf.mxu0  ;;  %v1377_v56 = vpop.f32.mrf.mxu1 }
 0x128   : > { %v1330_v51 = vadd.f32 %v1329_v49, %v1328_v43  ;;  %v1378_v58 = vadd.f32 %v1377_v56, %v1376_v48  ;;  %v1034_v3 = vadd.f32 %v1033_v59, %v1003_v55 }
 0x129   : > { %v1331_v57 = vpop.f32.mrf.mxu0  ;;  %v1379_v63 = vpop.f32.mrf.mxu1 }
 0x12a   : > { %935 = vst [vmem:[%s1646_s7 + $0x70] sm:$0xff] %v1330_v51  ;;  %v1004_v62 = vmul.f32 %v1330_v51, %v1330_v51  ;;  %951 = vst [vmem:[%s1646_s7 + $0xf0] sm:$0xff] %v1378_v58  ;;  %v966_v4 = vadd.f32 %v1330_v51, %v965_v61  ;;  %v1020_v51 = vmul.f32 %v1378_v58, %v1378_v58 }
 0x12b   : > { %v1332_v0 = vpop.f32.mrf.mxu0  ;;  %v1380_v6 = vpop.f32.mrf.mxu1 }
 0x12c   : > { %v1333_v5 = vadd.f32 %v1332_v0, %v1331_v57  ;;  %v1381_v7 = vadd.f32 %v1380_v6, %v1379_v63  ;;  %v1035_v9 = vadd.f32 %v1034_v3, %v1004_v62 }
 0x12e   : > { %936 = vst [vmem:[%s1646_s7 + $0x78] sm:$0xff] %v1333_v5  ;;  %v967_v10 = vadd.f32 %v1333_v5, %v966_v4  ;;  %v1005_v12 = vmul.f32 %v1333_v5, %v1333_v5  ;;  %952 = vst [vmem:[%s1646_s7 + $0xf8] sm:$0xff] %v1381_v7  ;;  %v1021_v59 = vmul.f32 %v1381_v7, %v1381_v7 }
 0x130   : > { %v968_v13 = vadd.f32 %v1650_v54, %v967_v10  ;;  %v1036_v15 = vadd.f32 %v1035_v9, %v1005_v12  ;;  %v1010_v54 = vmul.f32 %v1671_v14, %v1671_v14 }
 0x132   : > { %v969_v19 = vadd.f32 %v1656_v60, %v968_v13  ;;  %v1037_v17 = vadd.f32 %v1036_v15, %v1006_v11  ;;  %v1011_v60 = vmul.f32 %v1676_v20, %v1676_v20 }
 0x134   : > { %v970_v22 = vadd.f32 %v1661_v2, %v969_v19  ;;  %v1038_v24 = vadd.f32 %v1037_v17, %v1007_v18  ;;  %v1012_v2 = vmul.f32 %v1681_v26, %v1681_v26 }
 0x136   : > { %v971_v27 = vadd.f32 %v1666_v8, %v970_v22  ;;  %v1039_v23 = vadd.f32 %v1038_v24, %v1008_v21  ;;  %v1013_v8 = vmul.f32 %v1686_v32, %v1686_v32 }
 0x138   : > { %v1040_v28 = vadd.f32 %v1039_v23, %v1009_v25  ;;  %v972_v30 = vadd.f32 %v1671_v14, %v971_v27  ;;  %v1014_v14 = vmul.f32 %v1691_v39, %v1691_v39 }
 0x13a   : > { %v973_v33 = vadd.f32 %v1676_v20, %v972_v30  ;;  %v1041_v34 = vadd.f32 %v1040_v28, %v1010_v54 }
 0x13c   : > { %v974_v29 = vadd.f32 %v1681_v26, %v973_v33  ;;  %v1042_v35 = vadd.f32 %v1041_v34, %v1011_v60 }
 0x13e   : > { %v975_v37 = vadd.f32 %v1686_v32, %v974_v29  ;;  %v1043_v38 = vadd.f32 %v1042_v35, %v1012_v2 }
 0x140   : > { %v976_v40 = vadd.f32 %v1691_v39, %v975_v37  ;;  %v1044_v41 = vadd.f32 %v1043_v38, %v1013_v8  ;;  %v1017_v39 = vmul.f32 %v1709_v16, %v1709_v16 }
 0x142   : > { %v977_v20 = vadd.f32 %v1699_v52, %v976_v40  ;;  %v1045_v42 = vadd.f32 %v1044_v41, %v1014_v14  ;;  %v1018_v52 = vmul.f32 %v1714_v31, %v1714_v31 }
 0x144   : > { %v1046_v26 = vadd.f32 %v1045_v42, %v1015_v36  ;;  %v978_v43 = vadd.f32 %v1704_v1, %v977_v20  ;;  %v1019_v1 = vmul.f32 %v1719_v44, %v1719_v44 }
 0x146   : > { %v1047_v32 = vadd.f32 %v1046_v26, %v1016_v45  ;;  %v979_v46 = vadd.f32 %v1709_v16, %v978_v43 }
 0x148   : > { %v1048_v47 = vadd.f32 %v1047_v32, %v1017_v39  ;;  %v980_v48 = vadd.f32 %v1714_v31, %v979_v46 }
 0x14a   : > { %v1049_v49 = vadd.f32 %v1048_v47, %v1018_v52  ;;  %v981_v50 = vadd.f32 %v1719_v44, %v980_v48 }
 0x14c   : > { %v1050_v53 = vadd.f32 %v1049_v49, %v1019_v1  ;;  %v982_v55 = vadd.f32 %v1378_v58, %v981_v50 }
 0x14e   : > { %v1051_v56 = vadd.f32 %v1050_v53, %v1020_v51  ;;  %v983_v57 = vadd.f32 %v1381_v7, %v982_v55 }
 0x150   : > { %v984_v16 = vrot.slane %v983_v57, 4  ;;  %v1052_v61 = vadd.f32 %v1051_v56, %v1021_v59 }
 0x152   : > { %v985_v62 = vadd.f32 %v984_v16, %v983_v57  ;;  %v1053_v63 = vrot.slane %v1052_v61, 4 }
 0x154   : > { %v986_v0 = vrot.slane %v985_v62, 2  ;;  %v1054_v31 = vadd.f32 %v1053_v63, %v1052_v61 }
 0x156   : > { %v987_v3 = vadd.f32 %v986_v0, %v985_v62  ;;  %v1055_v4 = vrot.slane %v1054_v31, 2 }
 0x158   : > { %v988_v5 = vrot.slane %v987_v3, 1  ;;  %v1056_v6 = vadd.f32 %v1055_v4, %v1054_v31 }
 0x15a   : > { %v1057_v44 = vrot.slane %v1056_v6, 1  ;;  %v989_v9 = vadd.f32 %v988_v5, %v987_v3 }
 0x15c   : > { %v1058_v58 = vadd.f32 %v1057_v44, %v1056_v6 }
 0x15e   : > { %v1060_v7 = vsel %vm1059_vm0, %v989_v9, %v1058_v58 }
 0x15f   : > { %v1062_v10 = vsel %vm1061_vm1, %v1060_v7, 0.0 }
 0x160   : > { %1063 = vst [vmem:[%s271_s9] sm:$0xff] %v1062_v10 }
 0x161 PF: > { %s14_s14 = sadd.s32 1, %s1508_s14   ;;  %s1788_s12 = smov %s1504_s13 }
 0x162   : > { %p11_p6 = scmp.ge.s32.totalorder %s14_s14, 4   ;;  %s1789_s13 = smov %s1791_s15 }
 0x164   :  { %13 = sbr.rel (!%p11_p6) target bundleno = 2 (0x2), region = 81 }

</bundles_post_ra>
